<compile_context>
chip_gen: v6e
topology: v6e:2x2x1
jax: 0.10.0
libtpu: 0.0.40
codegen_flags: <defaults>
</compile_context>

<pallas_src>
import functools

import jax
import jax.numpy as jnp
from jax.experimental import pallas as pl
from jax.experimental.pallas import tpu as pltpu

_NEG_PAD_BIAS = -1e30        # padded logit lanes -> exp() == 0 inside the LSE
_LANES = 128                 # lane-dense (unmasked-store) output width
_COMPUTE_DTYPE = jnp.bfloat16


def _round_up(x, m):
    return ((x + m - 1) // m) * m


def _net_kernel(alpha_ref, x_ref, w_hf_ref, b_hf_ref, w2_ref, b2_ref, o_ref):
    # PReLU alphas as SMEM scalars.
    a0 = alpha_ref[0]
    a1 = alpha_ref[1]

    # ---- PReLU #0 (self.relu), bf16 on the VPU ----
    x = x_ref[...]
    x = jnp.where(x >= 0, x, a0.astype(x.dtype) * x)

    # ---- fused hidden + classifier[0]: Linear(128 -> 64) on the MXU ----
    z = jnp.dot(x, w_hf_ref[...], preferred_element_type=jnp.float32)
    z = z + b_hf_ref[...]

    # ---- classifier[1]: PReLU (fp32) ----
    z = jnp.where(z >= 0, z, a1 * z)

    # ---- classifier[2]: Dropout(0.5) -> identity at inference ----
    # TODO(synk): training-mode dropout (random mask + 2x scale) not implemented.

    # ---- classifier[3]: Linear(64 -> 10), padded to 128 output lanes ----
    logits = jnp.dot(z.astype(w2_ref.dtype), w2_ref[...],
                     preferred_element_type=jnp.float32)
    logits = logits + b2_ref[...]          # pad lanes carry a -1e30 bias

    # ---- F.log_softmax over dim=1 (pad lanes contribute exp() == 0) ----
    m = jnp.max(logits, axis=1, keepdims=True)
    s = logits - m
    lse = jnp.log(jnp.sum(jnp.exp(s), axis=1, keepdims=True))
    o_ref[...] = (s - lse).astype(o_ref.dtype)     # bf16, lane-dense store


def init_params(key, num_in_features=128, num_out_classes=10):
    """Deterministic synthetic parameter init (shapes match the nn.Module)."""
    nf = num_in_features
    half = nf // 2
    ks = jax.random.split(key, 6)

    def linear(kw, kb, fan_in, fan_out):
        # PyTorch Linear default init: U(-1/sqrt(fan_in), 1/sqrt(fan_in))
        bound = 1.0 / jnp.sqrt(jnp.float32(fan_in))
        w = jax.random.uniform(kw, (fan_out, fan_in), jnp.float32, -bound, bound)
        b = jax.random.uniform(kb, (fan_out,), jnp.float32, -bound, bound)
        # pre-transpose weight to (in, out); bias to (1, out) for broadcasting
        return w.T, b.reshape(1, fan_out)

    wh_t, bh = linear(ks[0], ks[1], nf, nf)                  # self.hidden
    w1_t, b1 = linear(ks[2], ks[3], nf, half)                # classifier[0]
    w2_t, b2 = linear(ks[4], ks[5], half, num_out_classes)   # classifier[3]
    a0 = jnp.float32(0.25)                                   # PReLU default alpha
    a1 = jnp.float32(0.25)
    return (a0, wh_t, bh, w1_t, b1, a1, w2_t, b2)


def prepare_params(params, compute_dtype=_COMPUTE_DTYPE):
    """Host-side fusion / padding / dtype prep (do once, reuse per call).

    Returns (weights_tuple_of_arrays, num_out_python_int).  The Python int is
    kept OUT of the jitted pytree so downstream slices stay static.
    """
    a0, wh_t, bh, w1_t, b1, a1, w2_t, b2 = params

    # Fuse hidden + fc1 (no nonlinearity between them), in fp32.
    w_hf = wh_t @ w1_t                       # (nf, nf/2)
    b_hf = bh @ w1_t + b1                    # (1, nf/2)

    # Pad the final layer to 128 output lanes for lane-dense stores.
    half, nout = w2_t.shape
    w2p = jnp.zeros((half, _LANES), jnp.float32).at[:, :nout].set(w2_t)
    b2p = jnp.full((1, _LANES), _NEG_PAD_BIAS, jnp.float32).at[:, :nout].set(b2)

    alphas = jnp.stack([a0, a1]).astype(jnp.float32)         # (2,) -> SMEM
    weights = (alphas,
               w_hf.astype(compute_dtype),
               b_hf.astype(jnp.float32),
               w2p.astype(compute_dtype),
               b2p.astype(jnp.float32))
    return weights, int(nout)


@functools.partial(jax.jit, static_argnames=("block_b",))
def classification_net1_padded(x, weights, *, block_b=2048):
    """x: (B, num_in_features). Returns (B, 128) bf16 log-probs; lanes beyond
    num_classes hold ~-1e30.  This is the bandwidth-optimal entry point: no
    column slice, lane-dense bf16 output."""
    alphas, w_hf, b_hf, w2p, b2p = weights
    B, NF = x.shape
    HALF = w_hf.shape[1]

    # bf16 activations in (PReLU commutes with the cast; alpha=0.25 is exact).
    if x.dtype != _COMPUTE_DTYPE:
        x = x.astype(_COMPUTE_DTYPE)

    # Tile selection: bound batch-pad waste, give the v7x megacore >=2 grid
    # points for non-trivial batches, and stay well inside v5e's 16 MiB
    # default scoped VMEM (TB<=2048 bf16 tiles: ~2 MiB double-buffered I/O).
    nt = max(1, pl.cdiv(B, block_b))
    if B > 16:
        nt = max(nt, 2)
    TB = _round_up(pl.cdiv(B, nt), 16)       # multiple of 16: bf16 sublane pack
    Bp = _round_up(B, TB)
    if Bp != B:
        x = jnp.pad(x, ((0, Bp - B), (0, 0)))

    grid = (Bp // TB,)
    smem_spec = pl.BlockSpec(memory_space=pltpu.MemorySpace.SMEM)

    cost = pl.CostEstimate(
        flops=2 * Bp * (NF * HALF + HALF * _LANES) + 6 * Bp * _LANES,
        transcendentals=Bp * (_LANES + 1),
        bytes_accessed=2 * Bp * (NF + _LANES)            # bf16 x in + out
        + 2 * (NF * HALF + HALF * _LANES)                # bf16 weights
        + 4 * (HALF + _LANES),                           # fp32 biases
    )

    out = pl.pallas_call(
        _net_kernel,
        out_shape=jax.ShapeDtypeStruct((Bp, _LANES), _COMPUTE_DTYPE),
        grid_spec=pltpu.PrefetchScalarGridSpec(
            num_scalar_prefetch=0,
            grid=grid,
            in_specs=[
                smem_spec,                                       # PReLU alphas
                pl.BlockSpec((TB, NF), lambda i: (i, 0)),        # x tile
                pl.BlockSpec((NF, HALF), lambda i: (0, 0)),      # fused W (resident)
                pl.BlockSpec((1, HALF), lambda i: (0, 0)),       # fused b
                pl.BlockSpec((HALF, _LANES), lambda i: (0, 0)),  # W2 (padded)
                pl.BlockSpec((1, _LANES), lambda i: (0, 0)),     # b2 (padded)
            ],
            out_specs=pl.BlockSpec((TB, _LANES), lambda i: (i, 0)),
        ),
        compiler_params=pltpu.CompilerParams(
            dimension_semantics=("parallel",),
        ),
        cost_estimate=cost,
    )(alphas, x, w_hf, b_hf, w2p, b2p)

    # Static row slice only (B is a Python int from x.shape).  Columns are left
    # lane-dense; narrowing to num_classes is the consumer's (cheap) choice.
    return out[:B]


def classification_net1(x, prepared, *, block_b=2048):
    """Convenience wrapper returning (B, num_classes) bf16 log-probs.

    For peak bandwidth in a larger graph, call classification_net1_padded and
    keep the lane-dense 128-wide output (skip the column slice)."""
    weights, num_out = prepared
    out = classification_net1_padded(x, weights, block_b=block_b)
    return out[:, :num_out]          # num_out is a plain Python int -> static


def reference_forward(x, params):
    """Pure-JAX fp32 reference (unfused, unpadded) for correctness checking."""
    a0, wh_t, bh, w1_t, b1, a1, w2_t, b2 = params
    h = jnp.where(x >= 0, x, a0 * x)
    h = h @ wh_t + bh
    h = h @ w1_t + b1
    h = jnp.where(h >= 0, h, a1 * h)
    logits = h @ w2_t + b2
    return jax.nn.log_softmax(logits, axis=1)


if __name__ == "__main__":
    key = jax.random.PRNGKey(0)
    k_in, k_par = jax.random.split(key)

    B, NF, NC = 8, 128, 10
    x = jax.random.normal(k_in, (B, NF), jnp.float32)
    params = init_params(k_par, num_in_features=NF, num_out_classes=NC)
    prepared = prepare_params(params)

    out = classification_net1(x, prepared)
    out = jax.block_until_ready(out)

    ref = reference_forward(x, params)
    assert out.shape == (B, NC)
    # bf16 activations/weights/output (fp32 accumulation): loosened tolerance.
    assert jnp.allclose(out.astype(jnp.float32), ref, atol=3e-2, rtol=3e-2), \
        "mismatch vs reference"

    # Also exercise the batch-padding path (B not a multiple of the tile).
    x2 = jax.random.normal(jax.random.PRNGKey(3), (5, NF), jnp.float32)
    out2 = jax.block_until_ready(classification_net1(x2, prepared))
    ref2 = reference_forward(x2, params)
    assert out2.shape == (5, NC)
    assert jnp.allclose(out2.astype(jnp.float32), ref2, atol=3e-2, rtol=3e-2), \
        "mismatch (padded batch)"

    print("KERNEL_OK")
</pallas_src>

<mosaic_0001>
module attributes {stable_mosaic.version = 11 : i64} {
  func.func @_net_kernel(%arg0: i32, %arg1: memref<2xf32, #tpu.memory_space<smem>>, %arg2: memref<16x128xbf16, #tpu.memory_space<vmem>>, %arg3: memref<128x64xbf16, #tpu.memory_space<vmem>>, %arg4: memref<1x64xf32, #tpu.memory_space<vmem>>, %arg5: memref<64x128xbf16, #tpu.memory_space<vmem>>, %arg6: memref<1x128xf32, #tpu.memory_space<vmem>>, %arg7: memref<16x128xbf16, #tpu.memory_space<vmem>>) attributes {dimension_semantics = [#tpu.dimension_semantics<parallel>], iteration_bounds = array<i64: 1>, scalar_prefetch = 0 : i64, scratch_operands = 0 : i64, tpu.core_type = #tpu.core_type<tc>, window_params = [{transform_indices = @transform_0, window_bounds = array<i64: 2>}, {transform_indices = @transform_1, window_bounds = array<i64: 16, 128>}, {pipeline_mode = #tpu.pipeline_mode<synchronous>, transform_indices = @transform_2, window_bounds = array<i64: 128, 64>}, {pipeline_mode = #tpu.pipeline_mode<synchronous>, transform_indices = @transform_3, window_bounds = array<i64: 1, 64>}, {pipeline_mode = #tpu.pipeline_mode<synchronous>, transform_indices = @transform_4, window_bounds = array<i64: 64, 128>}, {pipeline_mode = #tpu.pipeline_mode<synchronous>, transform_indices = @transform_5, window_bounds = array<i64: 1, 128>}, {transform_indices = @transform_6, window_bounds = array<i64: 16, 128>}]} {
    %c0 = arith.constant 0 : index
    %0 = memref.load %arg1[%c0] : memref<2xf32, #tpu.memory_space<smem>>
    %c1 = arith.constant 1 : index
    %1 = memref.load %arg1[%c1] : memref<2xf32, #tpu.memory_space<smem>>
    %c0_0 = arith.constant 0 : index
    %c0_1 = arith.constant 0 : index
    %2 = vector.load %arg2[%c0_0, %c0_1] : memref<16x128xbf16, #tpu.memory_space<vmem>>, vector<16x128xbf16>
    %cst = arith.constant 0.000000e+00 : bf16
    %3 = vector.broadcast %cst : bf16 to vector<16x128xbf16>
    %4 = arith.cmpf oge, %2, %3 : vector<16x128xbf16>
    %5 = arith.truncf %0 : f32 to bf16
    %6 = vector.broadcast %5 : bf16 to vector<16x128xbf16>
    %7 = arith.mulf %6, %2 : vector<16x128xbf16>
    %8 = arith.select %4, %2, %7 : vector<16x128xi1>, vector<16x128xbf16>
    %c0_2 = arith.constant 0 : index
    %c0_3 = arith.constant 0 : index
    %9 = vector.load %arg3[%c0_2, %c0_3] : memref<128x64xbf16, #tpu.memory_space<vmem>>, vector<128x64xbf16>
    %cst_4 = arith.constant dense<0.000000e+00> : vector<16x64xf32>
    %10 = tpu.matmul %8, %9, %cst_4 {dimension_numbers = #tpu.dot_dimension_numbers<[1], [0], [0], [1], [0, 0, 1, 1], [], []>} : vector<16x128xbf16>, vector<128x64xbf16>, vector<16x64xf32> -> vector<16x64xf32>
    %c0_5 = arith.constant 0 : index
    %c0_6 = arith.constant 0 : index
    %11 = vector.load %arg4[%c0_5, %c0_6] : memref<1x64xf32, #tpu.memory_space<vmem>>, vector<1x64xf32>
    %12 = vector.broadcast %11 : vector<1x64xf32> to vector<16x64xf32>
    %13 = arith.addf %10, %12 : vector<16x64xf32>
    %cst_7 = arith.constant 0.000000e+00 : f32
    %14 = vector.broadcast %cst_7 : f32 to vector<16x64xf32>
    %15 = arith.cmpf oge, %13, %14 : vector<16x64xf32>
    %16 = vector.broadcast %1 : f32 to vector<16x64xf32>
    %17 = arith.mulf %16, %13 : vector<16x64xf32>
    %18 = arith.select %15, %13, %17 : vector<16x64xi1>, vector<16x64xf32>
    %19 = arith.truncf %18 : vector<16x64xf32> to vector<16x64xbf16>
    %c0_8 = arith.constant 0 : index
    %c0_9 = arith.constant 0 : index
    %20 = vector.load %arg5[%c0_8, %c0_9] : memref<64x128xbf16, #tpu.memory_space<vmem>>, vector<64x128xbf16>
    %cst_10 = arith.constant dense<0.000000e+00> : vector<16x128xf32>
    %21 = tpu.matmul %19, %20, %cst_10 {dimension_numbers = #tpu.dot_dimension_numbers<[1], [0], [0], [1], [0, 0, 1, 1], [], []>} : vector<16x64xbf16>, vector<64x128xbf16>, vector<16x128xf32> -> vector<16x128xf32>
    %c0_11 = arith.constant 0 : index
    %c0_12 = arith.constant 0 : index
    %22 = vector.load %arg6[%c0_11, %c0_12] : memref<1x128xf32, #tpu.memory_space<vmem>>, vector<1x128xf32>
    %23 = vector.broadcast %22 : vector<1x128xf32> to vector<16x128xf32>
    %24 = arith.addf %21, %23 : vector<16x128xf32>
    %cst_13 = arith.constant dense<0xFF800000> : vector<16xf32>
    %25 = vector.multi_reduction <maximumf>, %24, %cst_13 [1] : vector<16x128xf32> to vector<16xf32>
    %26 = vector.shape_cast %25 : vector<16xf32> to vector<16x1xf32>
    %27 = vector.broadcast %26 : vector<16x1xf32> to vector<16x128xf32>
    %28 = arith.subf %24, %27 : vector<16x128xf32>
    %29 = math.exp %28 : vector<16x128xf32>
    %cst_14 = arith.constant dense<0.000000e+00> : vector<16xf32>
    %30 = vector.multi_reduction <add>, %29, %cst_14 [1] : vector<16x128xf32> to vector<16xf32>
    %31 = vector.shape_cast %30 : vector<16xf32> to vector<16x1xf32>
    %32 = math.log %31 : vector<16x1xf32>
    %33 = vector.broadcast %32 : vector<16x1xf32> to vector<16x128xf32>
    %34 = arith.subf %28, %33 : vector<16x128xf32>
    %35 = arith.truncf %34 : vector<16x128xf32> to vector<16x128xbf16>
    %c0_15 = arith.constant 0 : index
    %c0_16 = arith.constant 0 : index
    %36 = vector.load %arg7[%c0_15, %c0_16] : memref<16x128xbf16, #tpu.memory_space<vmem>>, vector<16x128xbf16>
    tpu.vector_store %arg7[%c0_15, %c0_16], %35 {strides = array<i32>} : memref<16x128xbf16, #tpu.memory_space<vmem>>, vector<16x128xbf16>,
    return
  }
  func.func @transform_0(%arg0: i32) -> i32 {
    %c0_i32 = arith.constant 0 : i32
    %c0_i32_0 = arith.constant 0 : i32
    return %c0_i32 : i32
  }
  func.func @transform_1(%arg0: i32) -> (i32, i32) {
    %c0_i32 = arith.constant 0 : i32
    %c0_i32_0 = arith.constant 0 : i32
    return %arg0, %c0_i32 : i32, i32
  }
  func.func @transform_2(%arg0: i32) -> (i32, i32) {
    %c0_i32 = arith.constant 0 : i32
    %c0_i32_0 = arith.constant 0 : i32
    %c0_i32_1 = arith.constant 0 : i32
    return %c0_i32, %c0_i32_0 : i32, i32
  }
  func.func @transform_3(%arg0: i32) -> (i32, i32) {
    %c0_i32 = arith.constant 0 : i32
    %c0_i32_0 = arith.constant 0 : i32
    %c0_i32_1 = arith.constant 0 : i32
    return %c0_i32, %c0_i32_0 : i32, i32
  }
  func.func @transform_4(%arg0: i32) -> (i32, i32) {
    %c0_i32 = arith.constant 0 : i32
    %c0_i32_0 = arith.constant 0 : i32
    %c0_i32_1 = arith.constant 0 : i32
    return %c0_i32, %c0_i32_0 : i32, i32
  }
  func.func @transform_5(%arg0: i32) -> (i32, i32) {
    %c0_i32 = arith.constant 0 : i32
    %c0_i32_0 = arith.constant 0 : i32
    %c0_i32_1 = arith.constant 0 : i32
    return %c0_i32, %c0_i32_0 : i32, i32
  }
  func.func @transform_6(%arg0: i32) -> (i32, i32) {
    %c0_i32 = arith.constant 0 : i32
    %c0_i32_0 = arith.constant 0 : i32
    return %arg0, %c0_i32 : i32, i32
  }
}

</mosaic_0001>

<bundles_post_ra>
// kernel: classification_net1_padded.1
= control target key start
LH: loop header
LB: loop body
LE: loop exit
PB: predicated region body
PF: predicated region fallthrough
CT: control target
= control target key end

     0   :  { %11 = vsyncpa [#allocation3], 0  ;;  %s507_s0 = inlined_call_operand.vmem [shape: f32[2], index: 0, kind: input, shape index: {}]   ;;  %s508_s1 = inlined_call_operand.vmem [shape: bf16[16,128], index: 1, kind: input, shape index: {}]   ;;  %s509_s2 = inlined_call_operand.vmem [shape: bf16[128,64], index: 2, kind: input, shape index: {}]   ;;  %s510_s3 = inlined_call_operand.vmem [shape: f32[1,64], index: 3, kind: input, shape index: {}]   ;;  %s511_s4 = inlined_call_operand.vmem [shape: bf16[64,128], index: 4, kind: input, shape index: {}]   ;;  %s512_s5 = inlined_call_operand.vmem [shape: f32[1,128], index: 5, kind: input, shape index: {}]   ;;  %s513_s6 = inlined_call_operand.vmem [shape: bf16[16,128], index: 6, kind: output, shape index: {}]  }
   0x1   :  { %s18_s23 = sshll.u32 %s507_s0, 4  ;;  %s19_s23 = int_to_ptr.vmem [resolvable:$true] %s18_s23 }
   0x2   :  { %s401_s24 = scalar_lea.vmem %s19_s23, 16  ;;  %p406_p1 = scmp.lt.s32.totalorder %s19_s23, %s19_s23 }
   0x3   :  { %p402_p0 = scmp.ne.s32.totalorder %s19_s23, %s401_s24  ;;  %p407_p2 = scmp.lt.s32.totalorder %s401_s24, %s401_s24 }
   0x5   :  { %p408_p3 = por %p407_p2, %p406_p1 }
   0x7   :  { %p409_p4 = pnand %p408_p3, %p402_p0 }
   0x9   :  { %412 = shalt.err (!%p409_p4)
}
   0xa   :  { %s415_s25 = smov [#allocation2]  }
   0xb   :  { %21 = dma.vmem_to_smem %s19_s23, 16, %s415_s25, [#allocation3]  }
   0xc   :  { %413 = dma.done.wait [#allocation3], 16  }
   0xd   :  { %414 = vsyncadd [#allocation3], 4294967280 }
   0xe   :  { %35 = sfence }
   0xf   :  { %v381_v0 = vld [vmem:[%s509_s2 + $0x38] sm:$0xff]   ;;  %v416_v1 = vmov 0.0   ;;  %v382_v2 = vld [vmem:[%s509_s2 + $0x30] sm:$0xff]   ;;  %vm417_vm0 = vmmov 0   ;;  %v383_v3 = vld [vmem:[%s509_s2 + $0x28] sm:$0xff]   ;;  %s37_s7 = sld [smem:[#allocation2]] }
  0x10   :  { %346 = vmatprep.subr.bf16.mxu0 %v416_v1  ;;  %366 = vmatprep.subr.bf16.mxu1 %v416_v1  ;;  %v384_v4 = vld [vmem:[%s509_s2 + $0x20] sm:$0xff]   ;;  %v389_v5 = vld [vmem:[%s511_s4 + $0x18] sm:$0xff]   ;;  %v386_v7 = vld [vmem:[%s509_s2 + $0x10] sm:$0xff]   ;;  %s306_s11 = sld [smem:[#allocation2 + $0x1]]  ;;  %vm226_vm5 = vcmask 523264  }
  0x11   :  { %347 = vmatpush3.bf16.msra.mxu0 %v381_v0  ;;  %362 = vmatprep.mubr.msk.bf16.mxu0 %vm417_vm0, %v416_v1  ;;  %v385_v6 = vld [vmem:[%s509_s2 + $0x18] sm:$0xff]   ;;  %v39_v8 = vld [vmem:[%s508_s1] sm:$0xf]  ;;  %v40_v9 = vld [vmem:[%s508_s1 + $0x4] sm:$0xf] }
  0x12   :  { %348 = vmatprep.subr.bf16.mxu0 %v416_v1  ;;  %374 = vmatprep.mubr.msk.bf16.mxu1 %vm417_vm0, %v416_v1  ;;  %v387_v10 = vld [vmem:[%s509_s2 + $0x8] sm:$0xff]   ;;  %vm41_vm1 = vcmp.ge.bf16.partialorder %v39_v8, 0  ;;  %vm42_vm2 = vcmp.ge.bf16.partialorder %v40_v9, 0  ;;  %v388_v14 = vld [vmem:[%s509_s2] sm:$0xff]   ;;  %v390_v18 = vld [vmem:[%s511_s4 + $0x10] sm:$0xff]  }
  0x13   :  { %367 = vmatpush3.bf16.msra.mxu1 %v389_v5  ;;  %v391_v19 = vld [vmem:[%s511_s4 + $0x8] sm:$0xff]   ;;  %v392_v20 = vld [vmem:[%s511_s4] sm:$0xff]  }
  0x14   :  { %368 = vmatprep.subr.bf16.mxu1 %v416_v1  ;;  %v307_v21 = vld [vmem:[%s510_s3] ss:$0 sm:$0xff] }
  0x15   :  { %349 = vmatpush3.bf16.msra.mxu0 %v382_v2  ;;  %s45_s14 = sshrl.u32 %s37_s7, 16  ;;  %p44_p5 = scmp.ne.f32.partialorder %s37_s7, %s37_s7  ;;  %v317_v34 = vld [vmem:[%s512_s5] ss:$0 sm:$0xff] }
  0x16   :  { %350 = vmatprep.subr.bf16.mxu0 %v416_v1  ;;  %s46_s15 = sand.u32 1, %s45_s14  ;;  %v181_v24 = vstv %s306_s11 }
  0x17   :  { %s47_s16 = sadd.s32 32767, %s46_s15  ;;  %369 = vmatpush3.bf16.msra.mxu1 %v390_v18 }
  0x18   :  { %s48_s17 = sadd.s32 %s47_s16, %s37_s7  ;;  %370 = vmatprep.subr.bf16.mxu1 %v416_v1 }
  0x19   :  { %351 = vmatpush3.bf16.msra.mxu0 %v383_v3  ;;  %s49_s20 = sand.u32 4294901760, %s48_s17 }
  0x1a   :  { %352 = vmatprep.subr.bf16.mxu0 %v416_v1  ;;  %s515_s20 = smov (%p44_p5, %s49_s20), 2143289344 }
  0x1b   :  { %s52_s25 = sshrl.u32 %s515_s20, 16  ;;  %371 = vmatpush3.bf16.msra.mxu1 %v391_v19 }
  0x1c   :  { %s53_s0 = sshll.u32 %s52_s25, 16  ;;  %372 = vmatprep.subr.bf16.mxu1 %v416_v1 }
  0x1d   :  { %353 = vmatpush3.bf16.msra.mxu0 %v384_v4  ;;  %s54_s28 = sor.u32 %s53_s0, %s52_s25 }
  0x1e   :  { %354 = vmatprep.subr.bf16.mxu0 %v416_v1  ;;  %v55_v11 = vstv %s54_s28 }
  0x1f   :  { %v57_v12 = vmul.bf16 %v55_v11, %v39_v8  ;;  %v58_v13 = vmul.bf16 %v55_v11, %v40_v9  ;;  %373 = vmatpush3.bf16.msra.mxu1 %v392_v20 }
  0x21   :  { %355 = vmatpush3.bf16.msra.mxu0 %v385_v6  ;;  %v59_v15 = vsel %vm41_vm1, %v39_v8, %v57_v12  ;;  %v60_v16 = vsel %vm42_vm2, %v40_v9, %v58_v13 }
  0x22   :  { %356 = vmatprep.subr.bf16.mxu0 %v416_v1  ;;  %v308_v17 = vcombine.low %v59_v15, %v60_v16 }
  0x25   :  { %357 = vmatpush3.bf16.msra.mxu0 %v386_v7 }
  0x26   :  { %358 = vmatprep.subr.bf16.mxu0 %v416_v1 }
  0x29   :  { %359 = vmatpush3.bf16.msra.mxu0 %v387_v10 }
  0x2a   :  { %360 = vmatprep.subr.bf16.mxu0 %v416_v1 }
  0x2d   :  { %361 = vmatpush3.bf16.msra.mxu0 %v388_v14 }
  0x30   :  { %363 = vmatmul.mubr.bf16.vlgmr.msra.gmra.mxu0 %v308_v17 }
  0xf0   :  { %v172_v22 = vpop.f32.mrf.mxu0 }
  0xf1   :  { %v173_v23 = vadd.f32 %v307_v21, %v172_v22 }
  0xf2   :  { %v364_v25 = vpop.f32.mrf.mxu0 }
  0xf3   :  { %v182_v27 = vmul.f32 %v181_v24, %v173_v23  ;;  %vm179_vm3 = vcmp.ge.f32.partialorder %v173_v23, 0.0 }
  0xf4   :  { %v175_v26 = vpop.f32.mrf.mxu0 }
  0xf5   :  { %v176_v28 = vadd.f32 %v307_v21, %v175_v26  ;;  %v184_v31 = vsel %vm179_vm3, %v173_v23, %v182_v27 }
  0xf6   :  { %v365_v29 = vpop.f32.mrf.mxu0 }
  0xf7   :  { %vm180_vm4 = vcmp.ge.f32.partialorder %v176_v28, 0.0  ;;  %v183_v30 = vmul.f32 %v181_v24, %v176_v28 }
  0xf9   :  { %v185_v32 = vsel %vm180_vm4, %v176_v28, %v183_v30 }
  0xfa   :  { %v186_v33 = vpack.c.bf16 %v185_v32, %v184_v31 }
  0xfc   :  { %375 = vmatmul.mubr.msk.bf16.vlgmr.msra.gmra.mxu1 %vm226_vm5, %v186_v33 }
 0x1bc   :  { %v264_v35 = vpop.f32.mrf.mxu1 }
 0x1bd   :  { %v265_v36 = vadd.f32 %v317_v34, %v264_v35 }
 0x1be   :  { %v376_v37 = vpop.f32.mrf.mxu1 }
 0x1bf   :  { %271 = vmax.xlane.f32.xlu0 %v265_v36 }
 0x1c0   :  { %v267_v38 = vpop.f32.mrf.mxu1 }
 0x1c1   :  { %v268_v39 = vadd.f32 %v317_v34, %v267_v38 }
 0x1c2   :  { %v377_v40 = vpop.f32.mrf.mxu1 }
 0x1c3   :  { %273 = vmax.xlane.f32.xlu0 %v268_v39 }
 0x248   :  { %v272_v41 = vpop.xlane.xlu0 %271 }
 0x249   :  { %v275_v42 = vsub.f32 %v265_v36, %v272_v41 }
 0x24b   :  { %v277_v43 = vmul.f32 1.442695, %v275_v42 }
 0x24c   :  { %v274_v44 = vpop.xlane.xlu0 %273 }
 0x24d   :  { %v276_v45 = vsub.f32 %v268_v39, %v274_v44  ;;  %393 = vpow2.f32 %v277_v43 }
 0x24f   :  { %v279_v46 = vmul.f32 1.442695, %v276_v45 }
 0x251   :  { %395 = vpow2.f32 %v279_v46 }
 0x25a   :  { %v394_v47 = vpop.eup %393 }
 0x25b   :  { %281 = vadd.xlane.f32.xlu1 %v394_v47 }
 0x25e   :  { %v396_v48 = vpop.eup %395 }
 0x25f   :  { %283 = vadd.xlane.f32.xlu1 %v396_v48 }
 0x2e4   :  { %v282_v49 = vpop.xlane.xlu1 %281 }
 0x2e5   :  { %397 = vlog2.f32 %v282_v49 }
 0x2e8   :  { %v284_v50 = vpop.xlane.xlu1 %283 }
 0x2e9   :  { %399 = vlog2.f32 %v284_v50 }
 0x2f2   :  { %v398_v51 = vpop.eup %397 }
 0x2f3   :  { %v286_v52 = vmul.f32 0.6931472, %v398_v51 }
 0x2f5   :  { %v289_v55 = vsub.f32 %v275_v42, %v286_v52 }
 0x2f6   :  { %v400_v53 = vpop.eup %399 }
 0x2f7   :  { %v288_v54 = vmul.f32 0.6931472, %v400_v53 }
 0x2f9   :  { %v290_v56 = vsub.f32 %v276_v45, %v288_v54 }
 0x2fb   :  { %v330_v57 = vpack.c.bf16 %v290_v56, %v289_v55 }
 0x2fd   :  { %331 = vst [vmem:[%s513_s6] sm:$0xff] %v330_v57  }
 0x2fe   :  { %305 = vsyncpa [#allocation3], 1 }

</bundles_post_ra>
